<compile_context>
chip_gen: v7x
topology: tpu7x:2x2x1
jax: 0.10.0
libtpu: 0.0.40
codegen_flags: <defaults>
</compile_context>

<pallas_src>
import jax
import jax.numpy as jnp
from jax import lax
from jax.experimental import pallas as pl
from jax.experimental.pallas import tpu as pltpu

# ----- small, deterministic hyper-parameters (consistent with __init__) -----
B = 2            # batch
R = 16           # review_length
D = 32           # word_vec_dim
CONV_LEN = 3     # conv_length
K = 16           # conv_kernel_num
LATENT = 8       # latent_factor_num
FM_K = 4         # fm_k
L = R - CONV_LEN + 1   # conv output length == maxpool window
NR = 2 * B             # total reviews processed per call (user + item)


def deepconn_kernel(x_ref,                       # (NR*R + CONV_LEN-1, D) padded stacked reviews
                    wconv_ref, bconv_ref,        # (CONV_LEN*D, K), (1, K)
                    wenc_ref, benc_ref,          # (K, LATENT), (1, LATENT)
                    wdec_ref, bdec_ref,          # (LATENT, K), (1, K)
                    wfull_ref,                   # (L*K, R*D) banded deconv-as-matmul weight
                    wfm_ref, v_ref,              # (1, 2*LATENT), (2*LATENT, FM_K)
                    bdeconv_ref, bfm_ref,        # SMEM scalars (1, 1)
                    pred_ref, rest_ref):         # (B, 1), (NR, R*D)
    xv = x_ref[...]                                              # (NR*R+2, D)

    # ---- im2col: lane-concat of CONV_LEN shifted slabs -> (NR*R, CONV_LEN*D)
    wins = jnp.concatenate([xv[i:i + NR * R, :] for i in range(CONV_LEN)],
                           axis=1)                               # (64, 96)

    # ---- Conv2d + ReLU for all 2B reviews in ONE matmul -------------------
    conv = jnp.maximum(
        jnp.dot(wins, wconv_ref[...], preferred_element_type=jnp.float32)
        + bconv_ref[...], 0.0)                                   # (64, K)
    # rows n*R + l with l >= L straddle review boundaries -> never read below.

    # ---- per-review max-pool with first-max indices ------------------------
    iota_l = lax.broadcasted_iota(jnp.int32, (L, K), 0)
    mx_rows, idx_rows = [], []
    for n in range(NR):                       # NR = 4, static; slices 8-aligned
        blk = conv[n * R:n * R + L, :]                           # (L, K)
        m = jnp.max(blk, axis=0, keepdims=True)                  # (1, K)
        ix = jnp.min(jnp.where(blk == m, iota_l, L),
                     axis=0, keepdims=True)                      # (1, K) int32
        mx_rows.append(m)
        idx_rows.append(ix)
    mx = jnp.concatenate(mx_rows, axis=0)                        # (NR, K)
    idx = jnp.concatenate(idx_rows, axis=0)                      # (NR, K)

    # ---- Encoder / Decoder linears, batched over all 2B reviews ------------
    emb = jnp.maximum(
        jnp.dot(mx, wenc_ref[...], preferred_element_type=jnp.float32)
        + benc_ref[...], 0.0)                                    # (NR, LATENT)
    fc = (jnp.dot(emb, wdec_ref[...], preferred_element_type=jnp.float32)
          + bdec_ref[...])                                       # (NR, K)
    relu_fc = jnp.maximum(fc, 0.0)   # ReLU(unpool(fc)) == unpool(ReLU(fc))

    # ---- MaxUnpool directly in lane-major (NR, L*K) layout ------------------
    unpool = jnp.concatenate(
        [jnp.where(idx == l, relu_fc, 0.0) for l in range(L)],
        axis=1)                                                  # (NR, L*K)

    # ---- ConvTranspose2d as ONE matmul -> lane-dense restored embeddings ----
    rest = (jnp.dot(unpool, wfull_ref[...], preferred_element_type=jnp.float32)
            + bdeconv_ref[0, 0])                                 # (NR, R*D)
    rest_ref[...] = rest                                         # single aligned store

    # ---- FactorizationMachine on concat(user_emb, item_emb) ----------------
    cat = jnp.concatenate([emb[0:B, :], emb[B:NR, :]], axis=1)   # (B, 2*LATENT)
    w = jnp.sum(cat * wfm_ref[...], axis=1, keepdims=True) + bfm_ref[0, 0]
    vv = v_ref[...]
    inter1 = jnp.dot(cat, vv, preferred_element_type=jnp.float32)        # (B, FM_K)
    inter2 = jnp.dot(cat * cat, vv * vv, preferred_element_type=jnp.float32)
    pred_ref[...] = w + 0.5 * jnp.sum(inter1 * inter1 - inter2,
                                      axis=1, keepdims=True)     # (B, 1)


def deepconn_forward(user_review, item_review, params):
    """user_review/item_review: (B, 1, R, D) float32 (PyTorch NCHW)."""
    (wconv, bconv, wenc, benc, wdec, bdec,
     wdeconv, bdeconv, wfm, bfm, v) = params

    # --- glue: stack reviews + rearrange params (pure layout plumbing) ------
    x = jnp.concatenate([user_review[:, 0], item_review[:, 0]], axis=0)
    x = x.reshape(NR * R, D)
    x = jnp.pad(x, ((0, CONV_LEN - 1), (0, 0)))                  # (NR*R+2, D)

    wconv_k = jnp.transpose(wconv[:, 0], (1, 2, 0)).reshape(CONV_LEN * D, K)
    bconv_k = bconv.reshape(1, K)
    wenc_k = wenc.T                                              # (K, LATENT)
    benc_k = benc.reshape(1, LATENT)
    wdec_k = wdec.T                                              # (LATENT, K)
    bdec_k = bdec.reshape(1, K)

    # banded "ConvTranspose as matmul" weight: Wfull[l*K+k, r*D+d] =
    #   wdeconv[k, 0, r-l, d] if 0 <= r-l < CONV_LEN else 0.   (trace-time only)
    wd_flat = wdeconv[:, 0].reshape(K, CONV_LEN * D)
    wfull = jnp.zeros((L * K, R * D), jnp.float32)
    for l in range(L):
        wfull = wfull.at[l * K:(l + 1) * K, l * D:(l + CONV_LEN) * D].set(wd_flat)

    bdeconv_k = bdeconv.reshape(1, 1)
    bfm_k = bfm.reshape(1, 1)

    vmem = pl.BlockSpec(memory_space=pltpu.MemorySpace.VMEM)
    smem = pl.BlockSpec(memory_space=pltpu.MemorySpace.SMEM)
    pred, rest = pl.pallas_call(
        deepconn_kernel,
        out_shape=(jax.ShapeDtypeStruct((B, 1), jnp.float32),
                   jax.ShapeDtypeStruct((NR, R * D), jnp.float32)),
        in_specs=[vmem] * 10 + [smem, smem],
        out_specs=(vmem, vmem),
    )(x, wconv_k, bconv_k, wenc_k, benc_k, wdec_k, bdec_k,
      wfull, wfm, v, bdeconv_k, bfm_k)

    u_rest = rest[:B].reshape(B, 1, R, D)
    i_rest = rest[B:].reshape(B, 1, R, D)
    return pred[:, 0], u_rest, i_rest


def reference(user_review, item_review, params):
    """Plain-JAX reference of the PyTorch forward (for correctness check)."""
    (wconv, bconv, wenc, benc, wdec, bdec,
     wdeconv, bdeconv, wfm, bfm, v) = params

    def enc_dec(x):
        x2 = x[:, 0]                                                # (B,R,D)
        wins = jnp.stack([x2[:, t:t + CONV_LEN, :] for t in range(L)], axis=1)
        conv = jnp.einsum('blcd,kcd->blk', wins, wconv[:, 0]) + bconv
        conv = jnp.maximum(conv, 0.0)
        mx = conv.max(axis=1)                                       # (B,K)
        idx = conv.argmax(axis=1)                                   # (B,K)
        emb = jnp.maximum(mx @ wenc.T + benc, 0.0)                  # (B,LATENT)
        fc = emb @ wdec.T + bdec                                    # (B,K)
        unpool = jnp.where(jnp.arange(L)[None, :, None] == idx[:, None, :],
                           jnp.maximum(fc, 0.0)[:, None, :], 0.0)   # (B,L,K)
        out = jnp.full((B, R, D), bdeconv[0])
        for i in range(CONV_LEN):
            out = out.at[:, i:i + L, :].add(
                jnp.einsum('blk,kd->bld', unpool, wdeconv[:, 0, i, :]))
        return emb, out[:, None]

    ue, ur_rest = enc_dec(user_review)
    ie, ir_rest = enc_dec(item_review)
    cat = jnp.concatenate([ue, ie], axis=1)
    w = (cat @ wfm.T + bfm)[:, 0]
    inter1 = cat @ v
    inter2 = (cat ** 2) @ (v ** 2)
    pred = w + 0.5 * jnp.sum(inter1 ** 2 - inter2, axis=1)
    return pred, ur_rest, ir_rest


if __name__ == "__main__":
    key = jax.random.PRNGKey(0)
    keys = jax.random.split(key, 13)

    def rnd(k, shape, scale=0.1):
        return scale * jax.random.normal(k, shape, jnp.float32)

    params = (
        rnd(keys[0], (K, 1, CONV_LEN, D)),   # conv weight (Conv2d)
        rnd(keys[1], (K,)),                  # conv bias
        rnd(keys[2], (LATENT, K)),           # encoder linear weight
        rnd(keys[3], (LATENT,)),             # encoder linear bias
        rnd(keys[4], (K, LATENT)),           # decoder linear weight
        rnd(keys[5], (K,)),                  # decoder linear bias
        rnd(keys[6], (K, 1, CONV_LEN, D)),   # deconv weight (ConvTranspose2d)
        rnd(keys[7], (1,)),                  # deconv bias
        rnd(keys[8], (1, 2 * LATENT)),       # FM linear weight
        rnd(keys[9], (1,)),                  # FM linear bias
        rnd(keys[10], (2 * LATENT, FM_K)),   # FM v
    )
    user_review = rnd(keys[11], (B, 1, R, D), 1.0)
    item_review = rnd(keys[12], (B, 1, R, D), 1.0)

    # TODO(synk): FM dropout (train-mode only) is omitted — forward matches eval mode.
    pred, u_rest, i_rest = jax.jit(deepconn_forward)(user_review, item_review, params)
    jax.block_until_ready((pred, u_rest, i_rest))

    pred_r, u_rest_r, i_rest_r = reference(user_review, item_review, params)
    for got, want in ((pred, pred_r), (u_rest, u_rest_r), (i_rest, i_rest_r)):
        assert got.shape == want.shape, (got.shape, want.shape)
        assert jnp.allclose(got, want, atol=1e-2, rtol=1e-2), "mismatch vs reference"

    print("KERNEL_OK")
</pallas_src>

<mosaic_0001>
module attributes {stable_mosaic.version = 11 : i64} {
  func.func @deepconn_kernel(%arg0: memref<66x32xf32, #tpu.memory_space<vmem>>, %arg1: memref<96x16xf32, #tpu.memory_space<vmem>>, %arg2: memref<1x16xf32, #tpu.memory_space<vmem>>, %arg3: memref<16x8xf32, #tpu.memory_space<vmem>>, %arg4: memref<1x8xf32, #tpu.memory_space<vmem>>, %arg5: memref<8x16xf32, #tpu.memory_space<vmem>>, %arg6: memref<1x16xf32, #tpu.memory_space<vmem>>, %arg7: memref<224x512xf32, #tpu.memory_space<vmem>>, %arg8: memref<1x16xf32, #tpu.memory_space<vmem>>, %arg9: memref<16x4xf32, #tpu.memory_space<vmem>>, %arg10: memref<1x1xf32, #tpu.memory_space<smem>>, %arg11: memref<1x1xf32, #tpu.memory_space<smem>>, %arg12: memref<2x1xf32, #tpu.memory_space<vmem>>, %arg13: memref<4x512xf32, #tpu.memory_space<vmem>>) attributes {dimension_semantics = [], scalar_prefetch = 0 : i64, scratch_operands = 0 : i64, tpu.core_type = #tpu.core_type<tc>} {
    %c0 = arith.constant 0 : index
    %c0_0 = arith.constant 0 : index
    %0 = vector.load %arg0[%c0, %c0_0] : memref<66x32xf32, #tpu.memory_space<vmem>>, vector<66x32xf32>
    %1 = vector.extract_strided_slice %0 {offsets = [0, 0], sizes = [64, 32], strides = [1, 1]} : vector<66x32xf32> to vector<64x32xf32>
    %2 = vector.extract_strided_slice %0 {offsets = [1, 0], sizes = [64, 32], strides = [1, 1]} : vector<66x32xf32> to vector<64x32xf32>
    %3 = vector.extract_strided_slice %0 {offsets = [2, 0], sizes = [64, 32], strides = [1, 1]} : vector<66x32xf32> to vector<64x32xf32>
    %4 = tpu.concatenate %1, %2, %3 in 1 : vector<64x32xf32>, vector<64x32xf32>, vector<64x32xf32> -> vector<64x96xf32>
    %c0_1 = arith.constant 0 : index
    %c0_2 = arith.constant 0 : index
    %5 = vector.load %arg1[%c0_1, %c0_2] : memref<96x16xf32, #tpu.memory_space<vmem>>, vector<96x16xf32>
    %cst = arith.constant dense<0.000000e+00> : vector<64x16xf32>
    %6 = tpu.matmul %4, %5, %cst {dimension_numbers = #tpu.dot_dimension_numbers<[1], [0], [0], [1], [0, 0, 1, 1], [], []>} : vector<64x96xf32>, vector<96x16xf32>, vector<64x16xf32> -> vector<64x16xf32>
    %c0_3 = arith.constant 0 : index
    %c0_4 = arith.constant 0 : index
    %7 = vector.load %arg2[%c0_3, %c0_4] : memref<1x16xf32, #tpu.memory_space<vmem>>, vector<1x16xf32>
    %8 = vector.broadcast %7 : vector<1x16xf32> to vector<64x16xf32>
    %9 = arith.addf %6, %8 : vector<64x16xf32>
    %cst_5 = arith.constant 0.000000e+00 : f32
    %10 = vector.broadcast %cst_5 : f32 to vector<64x16xf32>
    %11 = arith.maximumf %9, %10 : vector<64x16xf32>
    %12 = tpu.iota {dimensions = array<i32: 0>} : vector<14x16xi32>
    %13 = vector.extract_strided_slice %11 {offsets = [0, 0], sizes = [14, 16], strides = [1, 1]} : vector<64x16xf32> to vector<14x16xf32>
    %cst_6 = arith.constant dense<0xFF800000> : vector<16xf32>
    %14 = vector.multi_reduction <maximumf>, %13, %cst_6 [0] : vector<14x16xf32> to vector<16xf32>
    %15 = vector.shape_cast %14 : vector<16xf32> to vector<1x16xf32>
    %16 = vector.broadcast %15 : vector<1x16xf32> to vector<14x16xf32>
    %17 = arith.cmpf oeq, %13, %16 : vector<14x16xf32>
    %c14_i32 = arith.constant 14 : i32
    %18 = vector.broadcast %c14_i32 : i32 to vector<14x16xi32>
    %19 = arith.select %17, %12, %18 : vector<14x16xi1>, vector<14x16xi32>
    %cst_7 = arith.constant dense<2147483647> : vector<16xi32>
    %20 = vector.multi_reduction <minsi>, %19, %cst_7 [0] : vector<14x16xi32> to vector<16xi32>
    %21 = vector.shape_cast %20 : vector<16xi32> to vector<1x16xi32>
    %22 = vector.extract_strided_slice %11 {offsets = [16, 0], sizes = [14, 16], strides = [1, 1]} : vector<64x16xf32> to vector<14x16xf32>
    %cst_8 = arith.constant dense<0xFF800000> : vector<16xf32>
    %23 = vector.multi_reduction <maximumf>, %22, %cst_8 [0] : vector<14x16xf32> to vector<16xf32>
    %24 = vector.shape_cast %23 : vector<16xf32> to vector<1x16xf32>
    %25 = vector.broadcast %24 : vector<1x16xf32> to vector<14x16xf32>
    %26 = arith.cmpf oeq, %22, %25 : vector<14x16xf32>
    %c14_i32_9 = arith.constant 14 : i32
    %27 = vector.broadcast %c14_i32_9 : i32 to vector<14x16xi32>
    %28 = arith.select %26, %12, %27 : vector<14x16xi1>, vector<14x16xi32>
    %cst_10 = arith.constant dense<2147483647> : vector<16xi32>
    %29 = vector.multi_reduction <minsi>, %28, %cst_10 [0] : vector<14x16xi32> to vector<16xi32>
    %30 = vector.shape_cast %29 : vector<16xi32> to vector<1x16xi32>
    %31 = vector.extract_strided_slice %11 {offsets = [32, 0], sizes = [14, 16], strides = [1, 1]} : vector<64x16xf32> to vector<14x16xf32>
    %cst_11 = arith.constant dense<0xFF800000> : vector<16xf32>
    %32 = vector.multi_reduction <maximumf>, %31, %cst_11 [0] : vector<14x16xf32> to vector<16xf32>
    %33 = vector.shape_cast %32 : vector<16xf32> to vector<1x16xf32>
    %34 = vector.broadcast %33 : vector<1x16xf32> to vector<14x16xf32>
    %35 = arith.cmpf oeq, %31, %34 : vector<14x16xf32>
    %c14_i32_12 = arith.constant 14 : i32
    %36 = vector.broadcast %c14_i32_12 : i32 to vector<14x16xi32>
    %37 = arith.select %35, %12, %36 : vector<14x16xi1>, vector<14x16xi32>
    %cst_13 = arith.constant dense<2147483647> : vector<16xi32>
    %38 = vector.multi_reduction <minsi>, %37, %cst_13 [0] : vector<14x16xi32> to vector<16xi32>
    %39 = vector.shape_cast %38 : vector<16xi32> to vector<1x16xi32>
    %40 = vector.extract_strided_slice %11 {offsets = [48, 0], sizes = [14, 16], strides = [1, 1]} : vector<64x16xf32> to vector<14x16xf32>
    %cst_14 = arith.constant dense<0xFF800000> : vector<16xf32>
    %41 = vector.multi_reduction <maximumf>, %40, %cst_14 [0] : vector<14x16xf32> to vector<16xf32>
    %42 = vector.shape_cast %41 : vector<16xf32> to vector<1x16xf32>
    %43 = vector.broadcast %42 : vector<1x16xf32> to vector<14x16xf32>
    %44 = arith.cmpf oeq, %40, %43 : vector<14x16xf32>
    %c14_i32_15 = arith.constant 14 : i32
    %45 = vector.broadcast %c14_i32_15 : i32 to vector<14x16xi32>
    %46 = arith.select %44, %12, %45 : vector<14x16xi1>, vector<14x16xi32>
    %cst_16 = arith.constant dense<2147483647> : vector<16xi32>
    %47 = vector.multi_reduction <minsi>, %46, %cst_16 [0] : vector<14x16xi32> to vector<16xi32>
    %48 = vector.shape_cast %47 : vector<16xi32> to vector<1x16xi32>
    %49 = tpu.concatenate %15, %24, %33, %42 in 0 : vector<1x16xf32>, vector<1x16xf32>, vector<1x16xf32>, vector<1x16xf32> -> vector<4x16xf32>
    %50 = tpu.concatenate %21, %30, %39, %48 in 0 : vector<1x16xi32>, vector<1x16xi32>, vector<1x16xi32>, vector<1x16xi32> -> vector<4x16xi32>
    %c0_17 = arith.constant 0 : index
    %c0_18 = arith.constant 0 : index
    %51 = vector.load %arg3[%c0_17, %c0_18] : memref<16x8xf32, #tpu.memory_space<vmem>>, vector<16x8xf32>
    %cst_19 = arith.constant dense<0.000000e+00> : vector<4x8xf32>
    %52 = tpu.matmul %49, %51, %cst_19 {dimension_numbers = #tpu.dot_dimension_numbers<[1], [0], [0], [1], [0, 0, 1, 1], [], []>} : vector<4x16xf32>, vector<16x8xf32>, vector<4x8xf32> -> vector<4x8xf32>
    %c0_20 = arith.constant 0 : index
    %c0_21 = arith.constant 0 : index
    %53 = vector.load %arg4[%c0_20, %c0_21] : memref<1x8xf32, #tpu.memory_space<vmem>>, vector<1x8xf32>
    %54 = vector.broadcast %53 : vector<1x8xf32> to vector<4x8xf32>
    %55 = arith.addf %52, %54 : vector<4x8xf32>
    %cst_22 = arith.constant 0.000000e+00 : f32
    %56 = vector.broadcast %cst_22 : f32 to vector<4x8xf32>
    %57 = arith.maximumf %55, %56 : vector<4x8xf32>
    %c0_23 = arith.constant 0 : index
    %c0_24 = arith.constant 0 : index
    %58 = vector.load %arg5[%c0_23, %c0_24] : memref<8x16xf32, #tpu.memory_space<vmem>>, vector<8x16xf32>
    %cst_25 = arith.constant dense<0.000000e+00> : vector<4x16xf32>
    %59 = tpu.matmul %57, %58, %cst_25 {dimension_numbers = #tpu.dot_dimension_numbers<[1], [0], [0], [1], [0, 0, 1, 1], [], []>} : vector<4x8xf32>, vector<8x16xf32>, vector<4x16xf32> -> vector<4x16xf32>
    %c0_26 = arith.constant 0 : index
    %c0_27 = arith.constant 0 : index
    %60 = vector.load %arg6[%c0_26, %c0_27] : memref<1x16xf32, #tpu.memory_space<vmem>>, vector<1x16xf32>
    %61 = vector.broadcast %60 : vector<1x16xf32> to vector<4x16xf32>
    %62 = arith.addf %59, %61 : vector<4x16xf32>
    %cst_28 = arith.constant 0.000000e+00 : f32
    %63 = vector.broadcast %cst_28 : f32 to vector<4x16xf32>
    %64 = arith.maximumf %62, %63 : vector<4x16xf32>
    %c0_i32 = arith.constant 0 : i32
    %65 = vector.broadcast %c0_i32 : i32 to vector<4x16xi32>
    %66 = arith.cmpi eq, %50, %65 : vector<4x16xi32>
    %cst_29 = arith.constant 0.000000e+00 : f32
    %67 = vector.broadcast %cst_29 : f32 to vector<4x16xf32>
    %68 = arith.select %66, %64, %67 : vector<4x16xi1>, vector<4x16xf32>
    %c1_i32 = arith.constant 1 : i32
    %69 = vector.broadcast %c1_i32 : i32 to vector<4x16xi32>
    %70 = arith.cmpi eq, %50, %69 : vector<4x16xi32>
    %cst_30 = arith.constant 0.000000e+00 : f32
    %71 = vector.broadcast %cst_30 : f32 to vector<4x16xf32>
    %72 = arith.select %70, %64, %71 : vector<4x16xi1>, vector<4x16xf32>
    %c2_i32 = arith.constant 2 : i32
    %73 = vector.broadcast %c2_i32 : i32 to vector<4x16xi32>
    %74 = arith.cmpi eq, %50, %73 : vector<4x16xi32>
    %cst_31 = arith.constant 0.000000e+00 : f32
    %75 = vector.broadcast %cst_31 : f32 to vector<4x16xf32>
    %76 = arith.select %74, %64, %75 : vector<4x16xi1>, vector<4x16xf32>
    %c3_i32 = arith.constant 3 : i32
    %77 = vector.broadcast %c3_i32 : i32 to vector<4x16xi32>
    %78 = arith.cmpi eq, %50, %77 : vector<4x16xi32>
    %cst_32 = arith.constant 0.000000e+00 : f32
    %79 = vector.broadcast %cst_32 : f32 to vector<4x16xf32>
    %80 = arith.select %78, %64, %79 : vector<4x16xi1>, vector<4x16xf32>
    %c4_i32 = arith.constant 4 : i32
    %81 = vector.broadcast %c4_i32 : i32 to vector<4x16xi32>
    %82 = arith.cmpi eq, %50, %81 : vector<4x16xi32>
    %cst_33 = arith.constant 0.000000e+00 : f32
    %83 = vector.broadcast %cst_33 : f32 to vector<4x16xf32>
    %84 = arith.select %82, %64, %83 : vector<4x16xi1>, vector<4x16xf32>
    %c5_i32 = arith.constant 5 : i32
    %85 = vector.broadcast %c5_i32 : i32 to vector<4x16xi32>
    %86 = arith.cmpi eq, %50, %85 : vector<4x16xi32>
    %cst_34 = arith.constant 0.000000e+00 : f32
    %87 = vector.broadcast %cst_34 : f32 to vector<4x16xf32>
    %88 = arith.select %86, %64, %87 : vector<4x16xi1>, vector<4x16xf32>
    %c6_i32 = arith.constant 6 : i32
    %89 = vector.broadcast %c6_i32 : i32 to vector<4x16xi32>
    %90 = arith.cmpi eq, %50, %89 : vector<4x16xi32>
    %cst_35 = arith.constant 0.000000e+00 : f32
    %91 = vector.broadcast %cst_35 : f32 to vector<4x16xf32>
    %92 = arith.select %90, %64, %91 : vector<4x16xi1>, vector<4x16xf32>
    %c7_i32 = arith.constant 7 : i32
    %93 = vector.broadcast %c7_i32 : i32 to vector<4x16xi32>
    %94 = arith.cmpi eq, %50, %93 : vector<4x16xi32>
    %cst_36 = arith.constant 0.000000e+00 : f32
    %95 = vector.broadcast %cst_36 : f32 to vector<4x16xf32>
    %96 = arith.select %94, %64, %95 : vector<4x16xi1>, vector<4x16xf32>
    %c8_i32 = arith.constant 8 : i32
    %97 = vector.broadcast %c8_i32 : i32 to vector<4x16xi32>
    %98 = arith.cmpi eq, %50, %97 : vector<4x16xi32>
    %cst_37 = arith.constant 0.000000e+00 : f32
    %99 = vector.broadcast %cst_37 : f32 to vector<4x16xf32>
    %100 = arith.select %98, %64, %99 : vector<4x16xi1>, vector<4x16xf32>
    %c9_i32 = arith.constant 9 : i32
    %101 = vector.broadcast %c9_i32 : i32 to vector<4x16xi32>
    %102 = arith.cmpi eq, %50, %101 : vector<4x16xi32>
    %cst_38 = arith.constant 0.000000e+00 : f32
    %103 = vector.broadcast %cst_38 : f32 to vector<4x16xf32>
    %104 = arith.select %102, %64, %103 : vector<4x16xi1>, vector<4x16xf32>
    %c10_i32 = arith.constant 10 : i32
    %105 = vector.broadcast %c10_i32 : i32 to vector<4x16xi32>
    %106 = arith.cmpi eq, %50, %105 : vector<4x16xi32>
    %cst_39 = arith.constant 0.000000e+00 : f32
    %107 = vector.broadcast %cst_39 : f32 to vector<4x16xf32>
    %108 = arith.select %106, %64, %107 : vector<4x16xi1>, vector<4x16xf32>
    %c11_i32 = arith.constant 11 : i32
    %109 = vector.broadcast %c11_i32 : i32 to vector<4x16xi32>
    %110 = arith.cmpi eq, %50, %109 : vector<4x16xi32>
    %cst_40 = arith.constant 0.000000e+00 : f32
    %111 = vector.broadcast %cst_40 : f32 to vector<4x16xf32>
    %112 = arith.select %110, %64, %111 : vector<4x16xi1>, vector<4x16xf32>
    %c12_i32 = arith.constant 12 : i32
    %113 = vector.broadcast %c12_i32 : i32 to vector<4x16xi32>
    %114 = arith.cmpi eq, %50, %113 : vector<4x16xi32>
    %cst_41 = arith.constant 0.000000e+00 : f32
    %115 = vector.broadcast %cst_41 : f32 to vector<4x16xf32>
    %116 = arith.select %114, %64, %115 : vector<4x16xi1>, vector<4x16xf32>
    %c13_i32 = arith.constant 13 : i32
    %117 = vector.broadcast %c13_i32 : i32 to vector<4x16xi32>
    %118 = arith.cmpi eq, %50, %117 : vector<4x16xi32>
    %cst_42 = arith.constant 0.000000e+00 : f32
    %119 = vector.broadcast %cst_42 : f32 to vector<4x16xf32>
    %120 = arith.select %118, %64, %119 : vector<4x16xi1>, vector<4x16xf32>
    %121 = tpu.concatenate %68, %72, %76, %80, %84, %88, %92, %96, %100, %104, %108, %112, %116, %120 in 1 : vector<4x16xf32>, vector<4x16xf32>, vector<4x16xf32>, vector<4x16xf32>, vector<4x16xf32>, vector<4x16xf32>, vector<4x16xf32>, vector<4x16xf32>, vector<4x16xf32>, vector<4x16xf32>, vector<4x16xf32>, vector<4x16xf32>, vector<4x16xf32>, vector<4x16xf32> -> vector<4x224xf32>
    %c0_43 = arith.constant 0 : index
    %c0_44 = arith.constant 0 : index
    %122 = vector.load %arg7[%c0_43, %c0_44] : memref<224x512xf32, #tpu.memory_space<vmem>>, vector<224x512xf32>
    %cst_45 = arith.constant dense<0.000000e+00> : vector<4x512xf32>
    %123 = tpu.matmul %121, %122, %cst_45 {dimension_numbers = #tpu.dot_dimension_numbers<[1], [0], [0], [1], [0, 0, 1, 1], [], []>} : vector<4x224xf32>, vector<224x512xf32>, vector<4x512xf32> -> vector<4x512xf32>
    %c0_46 = arith.constant 0 : index
    %c0_47 = arith.constant 0 : index
    %124 = memref.load %arg10[%c0_46, %c0_47] : memref<1x1xf32, #tpu.memory_space<smem>>
    %125 = vector.broadcast %124 : f32 to vector<4x512xf32>
    %126 = arith.addf %123, %125 : vector<4x512xf32>
    %c0_48 = arith.constant 0 : index
    %c0_49 = arith.constant 0 : index
    %127 = vector.load %arg13[%c0_48, %c0_49] : memref<4x512xf32, #tpu.memory_space<vmem>>, vector<4x512xf32>
    tpu.vector_store %arg13[%c0_48, %c0_49], %126 {strides = array<i32>} : memref<4x512xf32, #tpu.memory_space<vmem>>, vector<4x512xf32>,
    %128 = vector.extract_strided_slice %57 {offsets = [0, 0], sizes = [2, 8], strides = [1, 1]} : vector<4x8xf32> to vector<2x8xf32>
    %129 = vector.extract_strided_slice %57 {offsets = [2, 0], sizes = [2, 8], strides = [1, 1]} : vector<4x8xf32> to vector<2x8xf32>
    %130 = tpu.concatenate %128, %129 in 1 : vector<2x8xf32>, vector<2x8xf32> -> vector<2x16xf32>
    %c0_50 = arith.constant 0 : index
    %c0_51 = arith.constant 0 : index
    %131 = vector.load %arg8[%c0_50, %c0_51] : memref<1x16xf32, #tpu.memory_space<vmem>>, vector<1x16xf32>
    %132 = vector.broadcast %131 : vector<1x16xf32> to vector<2x16xf32>
    %133 = arith.mulf %130, %132 : vector<2x16xf32>
    %cst_52 = arith.constant dense<0.000000e+00> : vector<2xf32>
    %134 = vector.multi_reduction <add>, %133, %cst_52 [1] : vector<2x16xf32> to vector<2xf32>
    %135 = vector.shape_cast %134 : vector<2xf32> to vector<2x1xf32>
    %c0_53 = arith.constant 0 : index
    %c0_54 = arith.constant 0 : index
    %136 = memref.load %arg11[%c0_53, %c0_54] : memref<1x1xf32, #tpu.memory_space<smem>>
    %137 = vector.broadcast %136 : f32 to vector<2x1xf32>
    %138 = arith.addf %135, %137 : vector<2x1xf32>
    %c0_55 = arith.constant 0 : index
    %c0_56 = arith.constant 0 : index
    %139 = vector.load %arg9[%c0_55, %c0_56] : memref<16x4xf32, #tpu.memory_space<vmem>>, vector<16x4xf32>
    %cst_57 = arith.constant dense<0.000000e+00> : vector<2x4xf32>
    %140 = tpu.matmul %130, %139, %cst_57 {dimension_numbers = #tpu.dot_dimension_numbers<[1], [0], [0], [1], [0, 0, 1, 1], [], []>} : vector<2x16xf32>, vector<16x4xf32>, vector<2x4xf32> -> vector<2x4xf32>
    %141 = arith.mulf %130, %130 : vector<2x16xf32>
    %142 = arith.mulf %139, %139 : vector<16x4xf32>
    %cst_58 = arith.constant dense<0.000000e+00> : vector<2x4xf32>
    %143 = tpu.matmul %141, %142, %cst_58 {dimension_numbers = #tpu.dot_dimension_numbers<[1], [0], [0], [1], [0, 0, 1, 1], [], []>} : vector<2x16xf32>, vector<16x4xf32>, vector<2x4xf32> -> vector<2x4xf32>
    %144 = arith.mulf %140, %140 : vector<2x4xf32>
    %145 = arith.subf %144, %143 : vector<2x4xf32>
    %cst_59 = arith.constant dense<0.000000e+00> : vector<2xf32>
    %146 = vector.multi_reduction <add>, %145, %cst_59 [1] : vector<2x4xf32> to vector<2xf32>
    %147 = vector.shape_cast %146 : vector<2xf32> to vector<2x1xf32>
    %cst_60 = arith.constant 5.000000e-01 : f32
    %148 = vector.broadcast %cst_60 : f32 to vector<2x1xf32>
    %149 = arith.mulf %148, %147 : vector<2x1xf32>
    %150 = arith.addf %138, %149 : vector<2x1xf32>
    %c0_61 = arith.constant 0 : index
    %c0_62 = arith.constant 0 : index
    %151 = vector.load %arg12[%c0_61, %c0_62] : memref<2x1xf32, #tpu.memory_space<vmem>>, vector<2x1xf32>
    tpu.vector_store %arg12[%c0_61, %c0_62], %150 {strides = array<i32>} : memref<2x1xf32, #tpu.memory_space<vmem>>, vector<2x1xf32>,
    return
  }
}

</mosaic_0001>

<bundles_post_ra>
// kernel: deepconn_forward.1
= control target key start
LH: loop header
LB: loop body
LE: loop exit
PB: predicated region body
PF: predicated region fallthrough
CT: control target
= control target key end

     0   :  { %vm105_vm0 = vcmask 1045504   ;;  %vm63_vm1 = vcmask 1046528   ;;  %s1422_s18 = smov 64   ;;  %s1423_s19 = smov 32   ;;  %vm147_vm2 = vcmask 261120   ;;  %vm2183_vm3 = vcmask 523264   ;;  %s2165_s0 = inlined_call_operand.vmem [shape: f32[66,32], index: 0, kind: input, shape index: {}]   ;;  %s2166_s1 = inlined_call_operand.vmem [shape: f32[96,16], index: 1, kind: input, shape index: {}]   ;;  %s2167_s3 = inlined_call_operand.vmem [shape: f32[16,8], index: 3, kind: input, shape index: {}]   ;;  %s2168_s2 = inlined_call_operand.vmem [shape: f32[1,16], index: 2, kind: input, shape index: {}]   ;;  %s2169_s5 = inlined_call_operand.vmem [shape: f32[8,16], index: 5, kind: input, shape index: {}]   ;;  %s2170_s4 = inlined_call_operand.vmem [shape: f32[1,8], index: 4, kind: input, shape index: {}]   ;;  %s2171_s7 = inlined_call_operand.vmem [shape: f32[224,512], index: 7, kind: input, shape index: {}]   ;;  %s2172_s6 = inlined_call_operand.vmem [shape: f32[1,16], index: 6, kind: input, shape index: {}]   ;;  %s2173_s9 = inlined_call_operand.vmem [shape: f32[16,4], index: 9, kind: input, shape index: {}]   ;;  %s2174_s8 = inlined_call_operand.vmem [shape: f32[1,16], index: 8, kind: input, shape index: {}]   ;;  %s2175_s10 = inlined_call_operand.<no memory space> [shape: f32[1,1], index: 10, kind: input, shape index: {}]   ;;  %s2176_s13 = inlined_call_operand.vmem [shape: f32[4,512], index: 13, kind: output, shape index: {1}]   ;;  %s2177_s11 = inlined_call_operand.<no memory space> [shape: f32[1,1], index: 11, kind: input, shape index: {}]   ;;  %s2178_s12 = inlined_call_operand.vmem [shape: f32[2,1], index: 12, kind: output, shape index: {0}]  }
   0x1   :  { %v1506_v0 = vld [vmem:[%s2165_s0] sm:$0xff]  ;;  %v1511_v1 = vld [vmem:[%s2165_s0 + $0x8] sm:$0xff]  ;;  %v1516_v2 = vld [vmem:[%s2165_s0 + $0x10] sm:$0xff]  ;;  %vm2182_vm4 = vcmask 785408   ;;  %vm2180_vm5 = vmmov 0   ;;  %vm327_vm6 = vcmask 128000  }
   0x2   :  { %v106_v3 = vrot.slane %v1506_v0, 2  ;;  %v107_v4 = vrot.slane %v1511_v1, 2  ;;  %v64_v5 = vrot.slane %v1506_v0, 1  ;;  %v65_v6 = vrot.slane %v1511_v1, 1  ;;  %v1527_v9 = vld [vmem:[%s2165_s0 + $0x18] sm:$0xff]  ;;  %v1532_v10 = vld [vmem:[%s2165_s0 + $0x20] sm:$0xff] }
   0x3   :  { %v109_v7 = vrot.slane %v1516_v2, 2  ;;  %v67_v8 = vrot.slane %v1516_v2, 1  ;;  %v69_v15 = vrot.slane %v1527_v9, 1  ;;  %v71_v16 = vrot.slane %v1532_v10, 1  ;;  %v165_v17 = vld [vmem:[%s2166_s1] sm:$0xff]  ;;  %v166_v18 = vld [vmem:[%s2166_s1 + $0x8] sm:$0xff] }
   0x4   :  { %v108_v11 = vsel %vm105_vm0, %v106_v3, %v107_v4  ;;  %v66_v12 = vsel %vm63_vm1, %v64_v5, %v65_v6  ;;  %v167_v19 = vld [vmem:[%s2166_s1 + $0x10] sm:$0xff]  ;;  %v168_v20 = vld [vmem:[%s2166_s1 + $0x18] sm:$0xff]  ;;  %v111_v21 = vrot.slane %v1527_v9, 2  ;;  %v113_v24 = vrot.slane %v1532_v10, 2  ;;  %v1563_v26 = vld [vmem:[%s2165_s0 + $0x28] sm:$0xff]  ;;  %s1428_s14 = smov 48  }
   0x5   :  { %123 = vrot.lane.b32.xlu1 %v108_v11, %s1422_s18  ;;  %81 = vrot.lane.b32.xlu0 %v66_v12, %s1423_s19  ;;  %v110_v13 = vsel %vm105_vm0, %v107_v4, %v109_v7  ;;  %v68_v14 = vsel %vm63_vm1, %v65_v6, %v67_v8  ;;  %v72_v22 = vsel %vm63_vm1, %v69_v15, %v71_v16  ;;  %v1568_v27 = vld [vmem:[%s2165_s0 + $0x30] sm:$0xff]  ;;  %v169_v29 = vld [vmem:[%s2166_s1 + $0x20] sm:$0xff]  ;;  %v73_v33 = vrot.slane %v1563_v26, 1  ;;  %s1429_s24 = smov 80   ;;  %s1430_s25 = smov 96  }
   0x6   :  { %v70_v23 = vsel %vm63_vm1, %v67_v8, %v69_v15  ;;  %v1266_v25 = vpack.c.bf16 %v166_v18, %v165_v17  ;;  %v1270_v28 = vpack.c.bf16 %v168_v20, %v167_v19  ;;  %v170_v30 = vld [vmem:[%s2166_s1 + $0x28] sm:$0xff]  ;;  %v114_v31 = vsel %vm105_vm0, %v111_v21, %v113_v24  ;;  %v171_v36 = vld [vmem:[%s2166_s1 + $0x30] sm:$0xff]  ;;  %v172_v37 = vld [vmem:[%s2166_s1 + $0x38] sm:$0xff] }
   0x7   :  { %v112_v32 = vsel %vm105_vm0, %v109_v7, %v111_v21  ;;  %v75_v34 = vrot.slane %v1568_v27, 1  ;;  %v1274_v35 = vpack.c.bf16 %v170_v30, %v169_v29  ;;  %v74_v39 = vsel %vm63_vm1, %v71_v16, %v73_v33  ;;  %v1597_v42 = vld [vmem:[%s2165_s0 + $0x38] sm:$0xff]  ;;  %v53_v43 = vld [vmem:[%s2165_s0 + $0x40] sm:$0x3]  ;;  %v174_v46 = vld [vmem:[%s2166_s1 + $0x48] sm:$0xff]  ;;  %s1427_s0 = smov 16  }
   0x8   :  { %1267 = vmatprep.subr.bf16.mxu0 %v1266_v25  ;;  %v115_v40 = vrot.slane %v1563_v26, 2  ;;  %v117_v41 = vrot.slane %v1568_v27, 2  ;;  %v1278_v44 = vpack.c.bf16 %v172_v37, %v171_v36  ;;  %v173_v45 = vld [vmem:[%s2166_s1 + $0x40] sm:$0xff]  ;;  %v77_v49 = vrot.slane %v1597_v42, 1  ;;  %v175_v52 = vld [vmem:[%s2166_s1 + $0x50] sm:$0xff]  ;;  %v176_v53 = vld [vmem:[%s2166_s1 + $0x58] sm:$0xff] }
   0x9   :  { %125 = vrot.lane.b32.xlu1 %v110_v13, %s1422_s18  ;;  %83 = vrot.lane.b32.xlu0 %v68_v14, %s1423_s19  ;;  %v76_v38 = vsel %vm63_vm1, %v73_v33, %v75_v34  ;;  %v79_v50 = vrot.slane %v53_v43, 1  ;;  %v1282_v51 = vpack.c.bf16 %v174_v46, %v173_v45  ;;  %v119_v56 = vrot.slane %v1597_v42, 2  ;;  %v440_v30 = vld [vmem:[%s2167_s3] sm:$0xff] }
   0xa   :  { %1269 = vmatpush3.bf16.msra.mxu0 %v1266_v25  ;;  %v118_v47 = vsel %vm105_vm0, %v115_v40, %v117_v41  ;;  %v116_v48 = vsel %vm105_vm0, %v113_v24, %v115_v40  ;;  %v78_v55 = vsel %vm63_vm1, %v75_v34, %v77_v49  ;;  %v121_v57 = vrot.slane %v53_v43, 2  ;;  %v1155_v34 = vld [vmem:[%s2168_s2] ss:$0 sm:$0xff]  ;;  %s1432_s2 = smov 8  }
   0xb   :  { %1271 = vmatprep.subr.bf16.mxu0 %v1270_v28  ;;  %v80_v54 = vsel %vm63_vm1, %v77_v49, %v79_v50  ;;  %v1286_v58 = vpack.c.bf16 %v176_v53, %v175_v52  ;;  %v120_v60 = vsel %vm105_vm0, %v117_v41, %v119_v56  ;;  %v1426_v33 = vmov 0.0  }
   0xc   :  { %v122_v59 = vsel %vm105_vm0, %v119_v56, %v121_v57  ;;  %1244 = vmatprep.mubr.msk.f32.mxu1 %vm2180_vm5, %v1426_v33  ;;  %vm325_vm7 = vcmask 130048   ;;  %vm431_vm12 = vcmask 1040384  }
   0xd   :  { %87 = vrot.lane.b32.xlu1 %v72_v22, %s1423_s19  ;;  %85 = vrot.lane.b32.xlu0 %v70_v23, %s1423_s19 }
   0xe   :  { %1273 = vmatpush3.bf16.msra.mxu0 %v1270_v28 }
   0xf   :  { %1275 = vmatprep.subr.bf16.mxu0 %v1274_v35 }
  0x11   :  { %129 = vrot.lane.b32.xlu1 %v114_v31, %s1422_s18  ;;  %127 = vrot.lane.b32.xlu0 %v112_v32, %s1422_s18  ;;  %v441_v31 = vld [vmem:[%s2167_s3 + $0x8] sm:$0xff] }
  0x12   :  { %1277 = vmatpush3.bf16.msra.mxu0 %v1274_v35  ;;  %v1291_v32 = vpack.c.bf16 %v441_v31, %v440_v30 }
  0x13   :  { %1279 = vmatprep.subr.bf16.mxu0 %v1278_v44 }
  0x15   :  { %91 = vrot.lane.b32.xlu1 %v76_v38, %s1423_s19  ;;  %89 = vrot.lane.b32.xlu0 %v74_v39, %s1423_s19 }
  0x16   :  { %1281 = vmatpush3.bf16.msra.mxu0 %v1278_v44 }
  0x17   :  { %1283 = vmatprep.subr.bf16.mxu0 %v1282_v51 }
  0x19   :  { %133 = vrot.lane.b32.xlu1 %v118_v47, %s1422_s18  ;;  %131 = vrot.lane.b32.xlu0 %v116_v48, %s1422_s18  ;;  %v322_v48 = vlaneseq }
  0x1a   :  { %1285 = vmatpush3.bf16.msra.mxu0 %v1282_v51 }
  0x1b   :  { %1287 = vmatprep.subr.bf16.mxu0 %v1286_v58 }
  0x1d   :  { %95 = vrot.lane.b32.xlu1 %v80_v54, %s1423_s19  ;;  %93 = vrot.lane.b32.xlu0 %v78_v55, %s1423_s19  ;;  %v1678_v55 = vshrl.u32 %v322_v48, 7 }
  0x1e   :  { %1289 = vmatpush3.bf16.msra.mxu0 %v1286_v58 }
  0x21   :  { %137 = vrot.lane.b32.xlu1 %v122_v59, %s1422_s18  ;;  %135 = vrot.lane.b32.xlu0 %v120_v60, %s1422_s18 }
  0x77   :  { %v124_v61 = vpop.permute.xlu1 %123  ;;  %v82_v62 = vpop.permute.xlu0 %81 }
  0x78   :  { %v148_v63 = vsel %vm147_vm2, %v1506_v0, %v82_v62 }
  0x79   :  { %v157_v3 = vsel %vm2183_vm3, %v148_v63, %v124_v61 }
  0x7a   :  { %1228 = vmatprep.mubr.msk.f32.mxu0 %vm2182_vm4, %v157_v3  ;;  %v1684_v3 = vadd.s32 8, %v1678_v55 }
  0x7b   :  { %v126_v4 = vpop.permute.xlu1 %125  ;;  %v84_v5 = vpop.permute.xlu0 %83 }
  0x7c   :  { %v149_v6 = vsel %vm147_vm2, %v1511_v1, %v84_v5 }
  0x7d   :  { %v158_v7 = vsel %vm2183_vm3, %v149_v6, %v126_v4 }
  0x7e   :  { %1229 = vmatmul.mubr.msk.f32.vlgmr.msra.gmra.mrb[0].mxu0 %vm2182_vm4, %v158_v7 }
  0x7f   :  { %v88_v8 = vpop.permute.xlu1 %87  ;;  %v86_v11 = vpop.permute.xlu0 %85 }
  0x80   :  { %v151_v12 = vsel %vm147_vm2, %v1527_v9, %v88_v8  ;;  %v150_v0 = vsel %vm147_vm2, %v1516_v2, %v86_v11 }
  0x83   :  { %v130_v13 = vpop.permute.xlu1 %129  ;;  %v128_v14 = vpop.permute.xlu0 %127 }
  0x84   :  { %v160_v15 = vsel %vm2183_vm3, %v151_v12, %v130_v13  ;;  %v159_v16 = vsel %vm2183_vm3, %v150_v0, %v128_v14 }
  0x85   :  { %1231 = vmatprep.mubr.msk.f32.mxu0 %vm2182_vm4, %v159_v16 }
  0x86   :  { %1232 = vmatmul.mubr.msk.f32.gmra.mrb[2].mxu0 %vm2182_vm4, %v160_v15 }
  0x87   :  { %v92_v1 = vpop.permute.xlu1 %91  ;;  %v90_v17 = vpop.permute.xlu0 %89 }
  0x88   :  { %v153_v18 = vsel %vm147_vm2, %v1563_v26, %v92_v1  ;;  %v152_v9 = vsel %vm147_vm2, %v1532_v10, %v90_v17 }
  0x8b   :  { %v134_v19 = vpop.permute.xlu1 %133  ;;  %v132_v2 = vpop.permute.xlu0 %131 }
  0x8c   :  { %v162_v20 = vsel %vm2183_vm3, %v153_v18, %v134_v19  ;;  %v161_v21 = vsel %vm2183_vm3, %v152_v9, %v132_v2 }
  0x8d   :  { %1234 = vmatprep.mubr.msk.f32.mxu0 %vm2182_vm4, %v161_v21 }
  0x8e   :  { %1235 = vmatmul.mubr.msk.f32.gmra.mrb[4].mxu0 %vm2182_vm4, %v162_v20 }
  0x8f   :  { %v96_v22 = vpop.permute.xlu1 %95  ;;  %v94_v23 = vpop.permute.xlu0 %93 }
  0x90   :  { %v155_v24 = vsel %vm147_vm2, %v1597_v42, %v96_v22  ;;  %v154_v25 = vsel %vm147_vm2, %v1568_v27, %v94_v23  ;;  %v1424_v27 = vmov 0.0|0.0  }
  0x91   :  { %1290 = vmatprep.subr.bf16.mxu1 %v1424_v27 }
  0x92   :  { %1292 = vmatpush3.bf16.msra.mxu1 %v1291_v32 }
  0x93   :  { %v138_v26 = vpop.permute.xlu1 %137  ;;  %v136_v10 = vpop.permute.xlu0 %135  ;;  %1247 = vmatprep.subr.mxu1 %v1426_v33 }
  0x94   :  { %v164_v28 = vsel %vm2183_vm3, %v155_v24, %v138_v26  ;;  %v163_v29 = vsel %vm2183_vm3, %v154_v25, %v136_v10 }
  0x95   :  { %1237 = vmatprep.mubr.msk.f32.mxu0 %vm2182_vm4, %v163_v29 }
  0x96   :  { %1238 = vmatmul.mubr.msk.f32.gmra.mrb[6].mxu0 %vm2182_vm4, %v164_v28 }
 0x151   :  { %v1230_v35 = vpop.f32.mrb[0].mxu0 }
 0x152   :  { %v281_v36 = vadd.f32 %v1230_v35, %v1155_v34  ;;  %v275_v37 = vpop.f32.mrb[1].mxu0 }
 0x153   :  { %v276_v38 = vadd.f32 %v1155_v34, %v275_v37 }
 0x154   :  { %v315_v39 = vmax.f32 %v281_v36, 0.0 }
 0x155   :  { %v314_v40 = vmax.f32 %v276_v38, 0.0 }
 0x156   :  { %v328_v41 = vsel %vm327_vm6, %v315_v39, -inf }
 0x157   :  { %v326_v42 = vsel %vm325_vm7, %v314_v40, -inf }
 0x158   :  { %v329_v43 = vmax.f32 %v326_v42, %v328_v41 }
 0x159   :  { %v1233_v44 = vpop.f32.mrb[2].mxu0 }
 0x15a   :  { %v330_v45 = vrot.slane %v329_v43, 4  ;;  %v291_v46 = vadd.f32 %v1233_v44, %v1155_v34  ;;  %v285_v47 = vpop.f32.mrb[3].mxu0 }
 0x15b   :  { %v286_v49 = vadd.f32 %v1155_v34, %v285_v47 }
 0x15c   :  { %v331_v50 = vmax.f32 %v329_v43, %v330_v45  ;;  %v317_v51 = vmax.f32 %v291_v46, 0.0 }
 0x15d   :  { %v316_v52 = vmax.f32 %v286_v49, 0.0 }
 0x15e   :  { %v332_v53 = vrot.slane %v331_v50, 2  ;;  %v354_v54 = vsel %vm327_vm6, %v317_v51, -inf }
 0x15f   :  { %v353_v56 = vsel %vm325_vm7, %v316_v52, -inf }
 0x160   :  { %v333_v57 = vmax.f32 %v331_v50, %v332_v53  ;;  %v355_v58 = vmax.f32 %v353_v56, %v354_v54 }
 0x161   :  { %v1236_v59 = vpop.f32.mrb[4].mxu0 }
 0x162   :  { %v334_v60 = vrot.slane %v333_v57, 1  ;;  %v356_v61 = vrot.slane %v355_v58, 4  ;;  %v1681_v62 = vadd.f32 %v1236_v59, %v1155_v34  ;;  %v295_v63 = vpop.f32.mrb[5].mxu0 }
 0x163   :  { %v296_v4 = vadd.f32 %v1155_v34, %v295_v63 }
 0x164   :  { %v335_v5 = vmax.f32 %v333_v57, %v334_v60  ;;  %v357_v6 = vmax.f32 %v355_v58, %v356_v61  ;;  %v319_v7 = vmax.f32 %v1681_v62, 0.0 }
 0x165   :  { %v318_v8 = vmax.f32 %v296_v4, 0.0 }
 0x166   :  { %vm336_vm8 = vcmp.eq.f32.partialorder %v314_v40, %v335_v5  ;;  %vm337_vm9 = vcmp.eq.f32.partialorder %v315_v39, %v335_v5  ;;  %v358_v11 = vrot.slane %v357_v6, 2  ;;  %v380_v12 = vsel %vm327_vm6, %v319_v7, -inf }
 0x167   :  { %v338_v0 = vsel %vm336_vm8, %v1678_v55, 14  ;;  %v339_v13 = vsel %vm337_vm9, %v1684_v3, 14  ;;  %v379_v14 = vsel %vm325_vm7, %v318_v8, -inf  ;;  %vm433_vm8 = vcmask 1041408  }
 0x168   :  { %v340_v15 = vsel %vm325_vm7, %v338_v0, 2147483647  ;;  %v341_v16 = vsel %vm327_vm6, %v339_v13, 2147483647  ;;  %v359_v1 = vmax.f32 %v357_v6, %v358_v11  ;;  %v381_v17 = vmax.f32 %v379_v14, %v380_v12 }
 0x169   :  { %vm342_vm10 = vcmp.lt.s32.totalorder %v340_v15, %v341_v16  ;;  %v1239_v18 = vpop.f32.mrb[6].mxu0 }
 0x16a   :  { %v343_v9 = vsel %vm342_vm10, %v340_v15, %v341_v16  ;;  %v360_v19 = vrot.slane %v359_v1, 1  ;;  %v382_v2 = vrot.slane %v381_v17, 4  ;;  %v1693_v20 = vadd.f32 %v1239_v18, %v1155_v34  ;;  %v305_v21 = vpop.f32.mrb[7].mxu0 }
 0x16b   :  { %v344_v22 = vrot.slane %v343_v9, 4  ;;  %v306_v23 = vadd.f32 %v1155_v34, %v305_v21 }
 0x16c   :  { %v361_v24 = vmax.f32 %v359_v1, %v360_v19  ;;  %v383_v25 = vmax.f32 %v381_v17, %v382_v2  ;;  %v321_v26 = vmax.f32 %v1693_v20, 0.0 }
 0x16d   :  { %vm345_vm11 = vcmp.lt.s32.totalorder %v343_v9, %v344_v22  ;;  %v320_v10 = vmax.f32 %v306_v23, 0.0  ;;  %v523_v23 = vld [vmem:[%s2169_s5] sm:$0xff] }
 0x16e   :  { %v346_v28 = vsel %vm345_vm11, %v343_v9, %v344_v22  ;;  %vm362_vm13 = vcmp.eq.f32.partialorder %v316_v52, %v361_v24  ;;  %vm363_vm14 = vcmp.eq.f32.partialorder %v317_v51, %v361_v24  ;;  %v384_v29 = vrot.slane %v383_v25, 2 }
 0x16f   :  { %v347_v30 = vrot.slane %v346_v28, 2  ;;  %v364_v31 = vsel %vm362_vm13, %v1678_v55, 14  ;;  %v365_v32 = vsel %vm363_vm14, %v1684_v3, 14  ;;  %v406_v35 = vsel %vm327_vm6, %v321_v26, -inf }
 0x170   :  { %v366_v34 = vsel %vm325_vm7, %v364_v31, 2147483647  ;;  %v367_v36 = vsel %vm327_vm6, %v365_v32, 2147483647  ;;  %v385_v37 = vmax.f32 %v383_v25, %v384_v29  ;;  %v405_v38 = vsel %vm325_vm7, %v320_v10, -inf  ;;  %v698_v29 = vld [vmem:[%s2171_s7 + $0x8] sm:$0xff] }
 0x171   :  { %vm348_vm15 = vcmp.lt.s32.totalorder %v346_v28, %v347_v30  ;;  %vm368_vm0 = vcmp.lt.s32.totalorder %v366_v34, %v367_v36  ;;  %v407_v39 = vmax.f32 %v405_v38, %v406_v35  ;;  %v432_v40 = vsel %vm431_vm12, %v335_v5, %v361_v24  ;;  %v1164_v24 = vld [vmem:[%s2170_s4] ss:$0 sm:$0xff] }
 0x172   :  { %v369_v41 = vsel %vm368_vm0, %v366_v34, %v367_v36  ;;  %v386_v42 = vrot.slane %v385_v37, 1  ;;  %v349_v43 = vsel %vm348_vm15, %v346_v28, %v347_v30  ;;  %vm435_vm15 = vcmask 1042432   ;;  %v702_v30 = vld [vmem:[%s2171_s7 + $0x28] sm:$0xff]  ;;  %v697_v31 = vld [vmem:[%s2171_s7] sm:$0xff]  ;;  %v700_v34 = vld [vmem:[%s2171_s7 + $0x18] sm:$0xff] }
 0x173   :  { %v370_v44 = vrot.slane %v369_v41, 4  ;;  %v408_v45 = vrot.slane %v407_v39, 4  ;;  %v350_v48 = vrot.slane %v349_v43, 1  ;;  %v1293_v32 = vpack.c.bf16 %v702_v30, %v698_v29  ;;  %v701_v35 = vld [vmem:[%s2171_s7 + $0x20] sm:$0xff]  ;;  %v704_v36 = vld [vmem:[%s2171_s7 + $0x38] sm:$0xff] }
 0x174   :  { %v387_v46 = vmax.f32 %v385_v37, %v386_v42  ;;  %v1295_v37 = vpack.c.bf16 %v701_v35, %v697_v31  ;;  %v1349_v38 = vpack.c.bf16 %v704_v36, %v700_v34  ;;  %v740_v29 = vld [vmem:[%s2171_s7 + $0x158] sm:$0xff]  ;;  %v737_v34 = vld [vmem:[%s2171_s7 + $0x140] sm:$0xff] }
 0x175   :  { %vm371_vm1 = vcmp.lt.s32.totalorder %v369_v41, %v370_v44  ;;  %v409_v47 = vmax.f32 %v407_v39, %v408_v45  ;;  %vm351_vm14 = vcmp.lt.s32.totalorder %v349_v43, %v350_v48  ;;  %v699_v39 = vld [vmem:[%s2171_s7 + $0x10] sm:$0xff]  ;;  %v709_v45 = vld [vmem:[%s2171_s7 + $0x60] sm:$0xff]  ;;  %v744_v30 = vld [vmem:[%s2171_s7 + $0x178] sm:$0xff] }
 0x176   :  { %v372_v49 = vsel %vm371_vm1, %v369_v41, %v370_v44  ;;  %vm388_vm9 = vcmp.eq.f32.partialorder %v318_v8, %v387_v46  ;;  %vm389_vm10 = vcmp.eq.f32.partialorder %v319_v7, %v387_v46  ;;  %v434_v57 = vsel %vm433_vm8, %v432_v40, %v387_v46  ;;  %v703_v40 = vld [vmem:[%s2171_s7 + $0x30] sm:$0xff]  ;;  %v706_v41 = vld [vmem:[%s2171_s7 + $0x48] sm:$0xff]  ;;  %v705_v44 = vld [vmem:[%s2171_s7 + $0x40] sm:$0xff]  ;;  %1350 = vmatprep.subr.bf16.mxu0 %v1349_v38 }
 0x177   :  { %v373_v50 = vrot.slane %v372_v49, 2  ;;  %v390_v51 = vsel %vm388_vm9, %v1678_v55, 14  ;;  %v391_v52 = vsel %vm389_vm10, %v1684_v3, 14  ;;  %v410_v53 = vrot.slane %v409_v47, 2  ;;  %v741_v36 = vld [vmem:[%s2171_s7 + $0x160] sm:$0xff] }
 0x178   :  { %v392_v54 = vsel %vm325_vm7, %v390_v51, 2147483647  ;;  %v393_v56 = vsel %vm327_vm6, %v391_v52, 2147483647  ;;  %v352_v5 = vsel %vm351_vm14, %v349_v43, %v350_v48  ;;  %v1351_v42 = vpack.c.bf16 %v703_v40, %v699_v39  ;;  %v710_v43 = vld [vmem:[%s2171_s7 + $0x68] sm:$0xff]  ;;  %v708_v48 = vld [vmem:[%s2171_s7 + $0x58] sm:$0xff] }
 0x179   :  { %vm374_vm11 = vcmp.lt.s32.totalorder %v372_v49, %v373_v50  ;;  %vm394_vm13 = vcmp.lt.s32.totalorder %v392_v54, %v393_v56  ;;  %v411_v58 = vmax.f32 %v409_v47, %v410_v53  ;;  %v1297_v46 = vpack.c.bf16 %v710_v43, %v706_v41  ;;  %v711_v52 = vld [vmem:[%s2171_s7 + $0x70] sm:$0xff]  ;;  %v714_v53 = vld [vmem:[%s2171_s7 + $0x88] sm:$0xff]  ;;  %v752_v43 = vld [vmem:[%s2171_s7 + $0x1b8] sm:$0xff] }
 0x17a   :  { %v375_v59 = vsel %vm374_vm11, %v372_v49, %v373_v50  ;;  %v395_v60 = vsel %vm394_vm13, %v392_v54, %v393_v56  ;;  %v1299_v47 = vpack.c.bf16 %v709_v45, %v705_v44  ;;  %v712_v49 = vld [vmem:[%s2171_s7 + $0x78] sm:$0xff]  ;;  %v707_v50 = vld [vmem:[%s2171_s7 + $0x50] sm:$0xff]  ;;  %1352 = vmatpush1.bf16.msra.mxu0 %v1351_v42  ;;  %v718_v54 = vld [vmem:[%s2171_s7 + $0xa8] sm:$0xff]  ;;  %v1369_v38 = vpack.c.bf16 %v744_v30, %v740_v29 }
 0x17b   :  { %v376_v61 = vrot.slane %v375_v59, 1  ;;  %v396_v62 = vrot.slane %v395_v60, 4  ;;  %v412_v63 = vrot.slane %v411_v58, 1  ;;  %v1353_v51 = vpack.c.bf16 %v712_v49, %v708_v48  ;;  %v743_v39 = vld [vmem:[%s2171_s7 + $0x170] sm:$0xff]  ;;  %v746_v40 = vld [vmem:[%s2171_s7 + $0x188] sm:$0xff]  ;;  %v748_v42 = vld [vmem:[%s2171_s7 + $0x198] sm:$0xff] }
 0x17c   :  { %v1355_v56 = vpack.c.bf16 %v711_v52, %v707_v50  ;;  %v750_v41 = vld [vmem:[%s2171_s7 + $0x1a8] sm:$0xff]  ;;  %v1315_v44 = vpack.c.bf16 %v741_v36, %v737_v34  ;;  %v749_v48 = vld [vmem:[%s2171_s7 + $0x1a0] sm:$0xff]  ;;  %v747_v49 = vld [vmem:[%s2171_s7 + $0x190] sm:$0xff]  ;;  %v1373_v50 = vpack.c.bf16 %v752_v43, %v748_v42 }
 0x17d   :  { %vm377_vm0 = vcmp.lt.s32.totalorder %v375_v59, %v376_v61  ;;  %vm397_vm1 = vcmp.lt.s32.totalorder %v395_v60, %v396_v62  ;;  %v413_v4 = vmax.f32 %v411_v58, %v412_v63  ;;  %v713_v58 = vld [vmem:[%s2171_s7 + $0x80] sm:$0xff]  ;;  %1354 = vmatprep.subr.bf16.mxu0 %v1353_v51  ;;  %v719_v63 = vld [vmem:[%s2171_s7 + $0xb0] sm:$0xff]  ;;  %v754_v52 = vld [vmem:[%s2171_s7 + $0x1c8] sm:$0xff] }
 0x17e   :  { %v378_v6 = vsel %vm377_vm0, %v375_v59, %v376_v61  ;;  %v398_v7 = vsel %vm397_vm1, %v395_v60, %v396_v62  ;;  %v717_v59 = vld [vmem:[%s2171_s7 + $0xa0] sm:$0xff]  ;;  %v716_v60 = vld [vmem:[%s2171_s7 + $0x98] sm:$0xff]  ;;  %v715_v62 = vld [vmem:[%s2171_s7 + $0x90] sm:$0xff]  ;;  %1356 = vmatpush1.bf16.msra.mxu0 %v1355_v56 }
 0x17f   :  { %v399_v8 = vrot.slane %v398_v7, 2  ;;  %vm414_vm9 = vcmp.eq.f32.partialorder %v320_v10, %v413_v4  ;;  %vm415_vm10 = vcmp.eq.f32.partialorder %v321_v26, %v413_v4  ;;  %v436_v11 = vsel %vm435_vm15, %v434_v57, %v413_v4  ;;  %v720_v61 = vld [vmem:[%s2171_s7 + $0xb8] sm:$0xff]  ;;  %v751_v51 = vld [vmem:[%s2171_s7 + $0x1b0] sm:$0xff]  ;;  %v778_v30 = vld [vmem:[%s2171_s7 + $0x288] sm:$0xff] }
 0x180   :  { %v416_v12 = vsel %vm414_vm9, %v1678_v55, 14  ;;  %v417_v0 = vsel %vm415_vm10, %v1684_v3, 14  ;;  %v437_v13 = vsel %vm431_vm12, %v352_v5, %v378_v6  ;;  %1245 = vmatmul.mubr.msk.f32.vlgmr.msra.gmra.mrb[0].mxu1 %vm325_vm7, %v436_v11  ;;  %v1301_v57 = vpack.c.bf16 %v718_v54, %v714_v53  ;;  %v722_v6 = vld [vmem:[%s2171_s7 + $0xc8] sm:$0xff]  ;;  %v756_v54 = vld [vmem:[%s2171_s7 + $0x1d8] sm:$0xff]  ;;  %v781_v34 = vld [vmem:[%s2171_s7 + $0x2a0] sm:$0xff] }
 0x181   :  { %vm400_vm11 = vcmp.lt.s32.totalorder %v398_v7, %v399_v8  ;;  %v418_v14 = vsel %vm325_vm7, %v416_v12, 2147483647  ;;  %v419_v15 = vsel %vm327_vm6, %v417_v0, 2147483647  ;;  %1249 = vmatprep.mubr.msk.f32.mxu1 %vm2180_vm5, %v1426_v33  ;;  %1248 = vmatpush3.msra.mxu1 %v523_v23  ;;  %vm2179_vm6 = vcmask 64512   ;;  %v725_v0 = vld [vmem:[%s2171_s7 + $0xe0] sm:$0xff] }
 0x182   :  { %v401_v16 = vsel %vm400_vm11, %v398_v7, %v399_v8  ;;  %vm420_vm13 = vcmp.lt.s32.totalorder %v418_v14, %v419_v15  ;;  %1294 = vmatprep.subr.bf16.mxu1 %v1293_v32  ;;  %v1303_v4 = vpack.c.bf16 %v717_v59, %v713_v58  ;;  %v1357_v5 = vpack.c.bf16 %v720_v61, %v716_v60  ;;  %v726_v7 = vld [vmem:[%s2171_s7 + $0xe8] sm:$0xff]  ;;  %v721_v8 = vld [vmem:[%s2171_s7 + $0xc0] sm:$0xff]  ;;  %v731_v23 = vld [vmem:[%s2171_s7 + $0x110] sm:$0xff] }
 0x183   :  { %v402_v1 = vrot.slane %v401_v16, 1  ;;  %v421_v17 = vsel %vm420_vm13, %v418_v14, %v419_v15  ;;  %v1359_v11 = vpack.c.bf16 %v719_v63, %v715_v62  ;;  %v1305_v12 = vpack.c.bf16 %v726_v7, %v722_v6  ;;  %v728_v14 = vld [vmem:[%s2171_s7 + $0xf8] sm:$0xff]  ;;  %v758_v53 = vld [vmem:[%s2171_s7 + $0x1e8] sm:$0xff]  ;;  %v753_v60 = vld [vmem:[%s2171_s7 + $0x1c0] sm:$0xff] }
 0x184   :  { %v422_v18 = vrot.slane %v421_v17, 4  ;;  %1358 = vmatprep.subr.bf16.mxu0 %v1357_v5  ;;  %v760_v56 = vld [vmem:[%s2171_s7 + $0x1f8] sm:$0xff]  ;;  %v1375_v58 = vpack.c.bf16 %v751_v51, %v747_v49  ;;  %v1321_v59 = vpack.c.bf16 %v758_v53, %v754_v52  ;;  %v757_v61 = vld [vmem:[%s2171_s7 + $0x1e0] sm:$0xff]  ;;  %v755_v62 = vld [vmem:[%s2171_s7 + $0x1d0] sm:$0xff] }
 0x185   :  { %vm403_vm14 = vcmp.lt.s32.totalorder %v401_v16, %v402_v1  ;;  %1360 = vmatpush1.bf16.msra.mxu0 %v1359_v11  ;;  %v1377_v63 = vpack.c.bf16 %v760_v56, %v756_v54  ;;  %v762_v5 = vld [vmem:[%s2171_s7 + $0x208] sm:$0xff]  ;;  %v764_v7 = vld [vmem:[%s2171_s7 + $0x218] sm:$0xff]  ;;  %v1323_v11 = vpack.c.bf16 %v757_v61, %v753_v60 }
 0x186   :  { %vm423_vm0 = vcmp.lt.s32.totalorder %v421_v17, %v422_v18  ;;  %v404_v55 = vsel %vm403_vm14, %v401_v16, %v402_v1  ;;  %v723_v16 = vld [vmem:[%s2171_s7 + $0xd0] sm:$0xff]  ;;  %v766_v6 = vld [vmem:[%s2171_s7 + $0x228] sm:$0xff]  ;;  %v780_v36 = vld [vmem:[%s2171_s7 + $0x298] sm:$0xff] }
 0x187   :  { %v424_v3 = vsel %vm423_vm0, %v421_v17, %v422_v18  ;;  %v438_v9 = vsel %vm433_vm8, %v437_v13, %v404_v55  ;;  %v724_v13 = vld [vmem:[%s2171_s7 + $0xd8] sm:$0xff]  ;;  %v727_v1 = vld [vmem:[%s2171_s7 + $0xf0] sm:$0xff]  ;;  %v730_v17 = vld [vmem:[%s2171_s7 + $0x108] sm:$0xff]  ;;  %v1307_v55 = vpack.c.bf16 %v725_v0, %v721_v8  ;;  %v1325_v0 = vpack.c.bf16 %v766_v6, %v762_v5 }
 0x188   :  { %v425_v19 = vrot.slane %v424_v3, 2  ;;  %v1361_v15 = vpack.c.bf16 %v728_v14, %v724_v13  ;;  %v734_v18 = vld [vmem:[%s2171_s7 + $0x128] sm:$0xff]  ;;  %v768_v8 = vld [vmem:[%s2171_s7 + $0x238] sm:$0xff]  ;;  %v761_v13 = vld [vmem:[%s2171_s7 + $0x200] sm:$0xff] }
 0x189   :  { %v765_v14 = vld [vmem:[%s2171_s7 + $0x220] sm:$0xff]  ;;  %v788_v51 = vld [vmem:[%s2171_s7 + $0x2d8] sm:$0xff]  ;;  %v798_v5 = vld [vmem:[%s2171_s7 + $0x328] sm:$0xff] }
 0x18a   :  { %vm426_vm12 = vcmp.lt.s32.totalorder %v424_v3, %v425_v19  ;;  %1362 = vmatprep.subr.bf16.mxu0 %v1361_v15  ;;  %v1381_v15 = vpack.c.bf16 %v768_v8, %v764_v7  ;;  %v792_v52 = vld [vmem:[%s2171_s7 + $0x2f8] sm:$0xff] }
 0x18b   :  { %v427_v2 = vsel %vm426_vm12, %v424_v3, %v425_v19  ;;  %v732_v3 = vld [vmem:[%s2171_s7 + $0x118] sm:$0xff]  ;;  %v1363_v19 = vpack.c.bf16 %v727_v1, %v723_v16  ;;  %v763_v16 = vld [vmem:[%s2171_s7 + $0x210] sm:$0xff]  ;;  %v1393_v56 = vpack.c.bf16 %v792_v52, %v788_v51 }
 0x18c   :  { %v428_v20 = vrot.slane %v427_v2, 1  ;;  %v767_v1 = vld [vmem:[%s2171_s7 + $0x230] sm:$0xff] }
 0x18d   :  { %1364 = vmatpush1.bf16.msra.mxu0 %v1363_v19 }
 0x18e   :  { %vm429_vm1 = vcmp.lt.s32.totalorder %v427_v2, %v428_v20 }
 0x18f   :  { %v430_v21 = vsel %vm429_vm1, %v427_v2, %v428_v20  ;;  %v1309_v2 = vpack.c.bf16 %v734_v18, %v730_v17  ;;  %v729_v20 = vld [vmem:[%s2171_s7 + $0x100] sm:$0xff]  ;;  %v1327_v17 = vpack.c.bf16 %v765_v14, %v761_v13  ;;  %v1383_v18 = vpack.c.bf16 %v767_v1, %v763_v16  ;;  %v796_v1 = vld [vmem:[%s2171_s7 + $0x318] sm:$0xff] }
 0x190   :  { %v1719_v22 = vsel %vm435_vm15, %v438_v9, %v430_v21  ;;  %v736_v9 = vld [vmem:[%s2171_s7 + $0x138] sm:$0xff]  ;;  %v733_v21 = vld [vmem:[%s2171_s7 + $0x120] sm:$0xff] }
 0x191   :  { %v1311_v31 = vpack.c.bf16 %v733_v21, %v729_v20  ;;  %v772_v20 = vld [vmem:[%s2171_s7 + $0x258] sm:$0xff]  ;;  %vm610_vm8 = vcmp.eq.s32.totalorder %v1719_v22, 2  ;;  %vm608_vm15 = vcmp.eq.s32.totalorder %v1719_v22, 1  ;;  %vm612_vm9 = vcmp.eq.s32.totalorder %v1719_v22, 3 }
 0x192   :  { %v776_v21 = vld [vmem:[%s2171_s7 + $0x278] sm:$0xff]  ;;  %vm624_vm10 = vcmp.eq.s32.totalorder %v1719_v22, 9  ;;  %vm614_vm11 = vcmp.eq.s32.totalorder %v1719_v22, 4  ;;  %vm626_vm13 = vcmp.eq.s32.totalorder %v1719_v22, 10  ;;  %vm616_vm14 = vcmp.eq.s32.totalorder %v1719_v22, 5 }
 0x193   :  { %vm628_vm0 = vcmp.eq.s32.totalorder %v1719_v22, 11  ;;  %vm618_vm12 = vcmp.eq.s32.totalorder %v1719_v22, 6  ;;  %vm630_vm1 = vcmp.eq.s32.totalorder %v1719_v22, 12  ;;  %vm632_vm5 = vcmp.eq.s32.totalorder %v1719_v22, 13 }
 0x194   :  { %vm606_vm4 = vcmp.eq.s32.totalorder %v1719_v22, 0  ;;  %vm622_vm3 = vcmp.eq.s32.totalorder %v1719_v22, 8 }
 0x253   :  { %v518_v25 = vpop.f32.mrb[0].mxu1 }
 0x254   :  { %v519_v26 = vadd.f32 %v1164_v24, %v518_v25  ;;  %v1246_v10 = vpop.f32.mrb[1].mxu1  ;;  %v1365_v24 = vpack.c.bf16 %v736_v9, %v732_v3  ;;  %v735_v25 = vld [vmem:[%s2171_s7 + $0x130] sm:$0xff]  ;;  %v774_v3 = vld [vmem:[%s2171_s7 + $0x268] sm:$0xff]  ;;  %v769_v9 = vld [vmem:[%s2171_s7 + $0x240] sm:$0xff] }
 0x255   :  { %v742_v10 = vld [vmem:[%s2171_s7 + $0x168] sm:$0xff]  ;;  %v1367_v32 = vpack.c.bf16 %v735_v25, %v731_v23  ;;  %v771_v25 = vld [vmem:[%s2171_s7 + $0x250] sm:$0xff] }
 0x256   :  { %v1727_v28 = vmax.f32 %v519_v26, 0.0  ;;  %v738_v26 = vld [vmem:[%s2171_s7 + $0x148] sm:$0xff]  ;;  %1366 = vmatprep.subr.bf16.mxu0 %v1365_v24  ;;  %v1385_v24 = vpack.c.bf16 %v776_v21, %v772_v20 }
 0x257   :  { %v1313_v35 = vpack.c.bf16 %v742_v10, %v738_v26  ;;  %1368 = vmatpush1.bf16.msra.mxu0 %v1367_v32  ;;  %v775_v26 = vld [vmem:[%s2171_s7 + $0x270] sm:$0xff]  ;;  %v1166_v10 = vld [vmem:[%s2172_s6] ss:$0 sm:$0xff] }
 0x258   :  { %1250 = vmatmul.mubr.msk.f32.vlgmr.msra.gmra.mrb[2].mxu1 %vm2179_vm6, %v1727_v28  ;;  %1370 = vmatprep.subr.bf16.mxu0 %v1369_v38  ;;  %v1387_v29 = vpack.c.bf16 %v775_v26, %v771_v25  ;;  %v777_v32 = vld [vmem:[%s2171_s7 + $0x280] sm:$0xff]  ;;  %vm620_vm6 = vcmp.eq.s32.totalorder %v1719_v22, 7  ;;  %v806_v22 = vld [vmem:[%s2171_s7 + $0x368] sm:$0xff] }
 0x259   :  { %1296 = vmatpush1.bf16.msra.mxu1 %v1295_v37  ;;  %v739_v37 = vld [vmem:[%s2171_s7 + $0x150] sm:$0xff]  ;;  %v1335_v38 = vpack.c.bf16 %v781_v34, %v777_v32  ;;  %v805_v26 = vld [vmem:[%s2171_s7 + $0x360] sm:$0xff] }
 0x25a   :  { %1298 = vmatprep.subr.bf16.mxu1 %v1297_v46  ;;  %v1371_v45 = vpack.c.bf16 %v743_v39, %v739_v37  ;;  %v1317_v46 = vpack.c.bf16 %v750_v41, %v746_v40  ;;  %v784_v37 = vld [vmem:[%s2171_s7 + $0x2b8] sm:$0xff]  ;;  %v779_v40 = vld [vmem:[%s2171_s7 + $0x290] sm:$0xff] }
 0x25b   :  { %v1389_v39 = vpack.c.bf16 %v784_v37, %v780_v36  ;;  %v783_v41 = vld [vmem:[%s2171_s7 + $0x2b0] sm:$0xff]  ;;  %v966_v36 = vrot.slane %v1727_v28, 2 }
 0x25c   :  { %1372 = vmatpush1.bf16.msra.mxu0 %v1371_v45  ;;  %v1391_v43 = vpack.c.bf16 %v783_v41, %v779_v40 }
 0x25d   :  { %1300 = vmatpush1.bf16.msra.mxu1 %v1299_v47  ;;  %v745_v47 = vld [vmem:[%s2171_s7 + $0x180] sm:$0xff]  ;;  %1374 = vmatprep.subr.bf16.mxu0 %v1373_v50 }
 0x25e   :  { %1302 = vmatprep.subr.bf16.mxu1 %v1301_v57  ;;  %v1319_v57 = vpack.c.bf16 %v749_v48, %v745_v47  ;;  %v790_v47 = vld [vmem:[%s2171_s7 + $0x2e8] sm:$0xff]  ;;  %v785_v48 = vld [vmem:[%s2171_s7 + $0x2c0] sm:$0xff] }
 0x25f   :  { %v789_v50 = vld [vmem:[%s2171_s7 + $0x2e0] sm:$0xff] }
 0x260   :  { %1376 = vmatpush1.bf16.msra.mxu0 %v1375_v58  ;;  %v1339_v54 = vpack.c.bf16 %v789_v50, %v785_v48  ;;  %v791_v58 = vld [vmem:[%s2171_s7 + $0x2f0] sm:$0xff]  ;;  %v987_v50 = vld [vmem:[%s2173_s9 + $0x8] sm:$0xff] }
 0x261   :  { %1304 = vmatpush1.bf16.msra.mxu1 %v1303_v4  ;;  %v759_v4 = vld [vmem:[%s2171_s7 + $0x1f0] sm:$0xff]  ;;  %1378 = vmatprep.subr.bf16.mxu0 %v1377_v63 }
 0x262   :  { %1306 = vmatprep.subr.bf16.mxu1 %v1305_v12  ;;  %v1379_v12 = vpack.c.bf16 %v759_v4, %v755_v62  ;;  %v794_v4 = vld [vmem:[%s2171_s7 + $0x308] sm:$0xff] }
 0x264   :  { %1380 = vmatpush1.bf16.msra.mxu0 %v1379_v12  ;;  %v793_v12 = vld [vmem:[%s2171_s7 + $0x300] sm:$0xff] }
 0x265   :  { %1308 = vmatpush1.bf16.msra.mxu1 %v1307_v55  ;;  %1382 = vmatprep.subr.bf16.mxu0 %v1381_v15  ;;  %v770_v55 = vld [vmem:[%s2171_s7 + $0x248] sm:$0xff] }
 0x266   :  { %1310 = vmatprep.subr.bf16.mxu1 %v1309_v2  ;;  %v1329_v19 = vpack.c.bf16 %v774_v3, %v770_v55  ;;  %v773_v2 = vld [vmem:[%s2171_s7 + $0x260] sm:$0xff]  ;;  %v1341_v3 = vpack.c.bf16 %v798_v5, %v794_v4  ;;  %v1063_v4 = vmul.f32 %v987_v50, %v987_v50 }
 0x267   :  { %v1331_v23 = vpack.c.bf16 %v773_v2, %v769_v9  ;;  %v799_v2 = vld [vmem:[%s2171_s7 + $0x330] sm:$0xff] }
 0x268   :  { %1384 = vmatpush1.bf16.msra.mxu0 %v1383_v18 }
 0x269   :  { %1312 = vmatpush1.bf16.msra.mxu1 %v1311_v31  ;;  %1386 = vmatprep.subr.bf16.mxu0 %v1385_v24  ;;  %v782_v31 = vld [vmem:[%s2171_s7 + $0x2a8] sm:$0xff]  ;;  %v801_v24 = vld [vmem:[%s2171_s7 + $0x340] sm:$0xff] }
 0x26a   :  { %1314 = vmatprep.subr.bf16.mxu1 %v1313_v35  ;;  %v1333_v35 = vpack.c.bf16 %v782_v31, %v778_v30  ;;  %v803_v30 = vld [vmem:[%s2171_s7 + $0x350] sm:$0xff]  ;;  %v1347_v32 = vpack.c.bf16 %v805_v26, %v801_v24 }
 0x26b   :  { %v807_v31 = vld [vmem:[%s2171_s7 + $0x370] sm:$0xff] }
 0x26c   :  { %1388 = vmatpush1.bf16.msra.mxu0 %v1387_v29  ;;  %v808_v29 = vld [vmem:[%s2171_s7 + $0x378] sm:$0xff]  ;;  %v1403_v34 = vpack.c.bf16 %v807_v31, %v803_v30 }
 0x26d   :  { %1316 = vmatpush1.bf16.msra.mxu1 %v1315_v44  ;;  %1390 = vmatprep.subr.bf16.mxu0 %v1389_v39 }
 0x26e   :  { %1318 = vmatprep.subr.bf16.mxu1 %v1317_v46  ;;  %v786_v46 = vld [vmem:[%s2171_s7 + $0x2c8] sm:$0xff] }
 0x26f   :  { %v1337_v49 = vpack.c.bf16 %v790_v47, %v786_v46 }
 0x270   :  { %1392 = vmatpush1.bf16.msra.mxu0 %v1391_v43 }
 0x271   :  { %1320 = vmatpush1.bf16.msra.mxu1 %v1319_v57  ;;  %v787_v57 = vld [vmem:[%s2171_s7 + $0x2d0] sm:$0xff]  ;;  %1394 = vmatprep.subr.bf16.mxu0 %v1393_v56 }
 0x272   :  { %1322 = vmatprep.subr.bf16.mxu1 %v1321_v59  ;;  %v1395_v59 = vpack.c.bf16 %v791_v58, %v787_v57 }
 0x274   :  { %1396 = vmatpush1.bf16.msra.mxu0 %v1395_v59 }
 0x275   :  { %1324 = vmatpush1.bf16.msra.mxu1 %v1323_v11 }
 0x276   :  { %1326 = vmatprep.subr.bf16.mxu1 %v1325_v0  ;;  %v797_v0 = vld [vmem:[%s2171_s7 + $0x320] sm:$0xff] }
 0x277   :  { %v1343_v9 = vpack.c.bf16 %v797_v0, %v793_v12 }
 0x279   :  { %1328 = vmatpush1.bf16.msra.mxu1 %v1327_v17  ;;  %v800_v17 = vld [vmem:[%s2171_s7 + $0x338] sm:$0xff] }
 0x27a   :  { %1330 = vmatprep.subr.bf16.mxu1 %v1329_v19  ;;  %v795_v19 = vld [vmem:[%s2171_s7 + $0x310] sm:$0xff]  ;;  %v1397_v20 = vpack.c.bf16 %v800_v17, %v796_v1 }
 0x27b   :  { %v1399_v21 = vpack.c.bf16 %v799_v2, %v795_v19 }
 0x27c   :  { %1398 = vmatprep.subr.bf16.mxu0 %v1397_v20 }
 0x27d   :  { %1332 = vmatpush1.bf16.msra.mxu1 %v1331_v23  ;;  %v802_v23 = vld [vmem:[%s2171_s7 + $0x348] sm:$0xff]  ;;  %1400 = vmatpush1.bf16.msra.mxu0 %v1399_v21 }
 0x27e   :  { %1334 = vmatprep.subr.bf16.mxu1 %v1333_v35  ;;  %v1345_v25 = vpack.c.bf16 %v806_v22, %v802_v23 }
 0x281   :  { %1336 = vmatpush1.bf16.msra.mxu1 %v1335_v38 }
 0x282   :  { %1338 = vmatprep.subr.bf16.mxu1 %v1337_v49  ;;  %v986_v49 = vld [vmem:[%s2173_s9] sm:$0xff] }
 0x283   :  { %v1406_v58 = vpack.c.bf16 %v987_v50, %v986_v49 }
 0x285   :  { %1340 = vmatpush1.bf16.msra.mxu1 %v1339_v54 }
 0x286   :  { %1342 = vmatprep.subr.bf16.mxu1 %v1341_v3 }
 0x289   :  { %1344 = vmatpush1.bf16.msra.mxu1 %v1343_v9 }
 0x28a   :  { %1346 = vmatprep.subr.bf16.mxu1 %v1345_v25  ;;  %v984_v25 = vstv %s2177_s11 }
 0x28d   :  { %1348 = vmatpush1.bf16.msra.mxu1 %v1347_v32 }
 0x28e   :  { %1405 = vmatprep.subr.bf16.mxu1 %v1424_v27 }
 0x32b   :  { %v601_v42 = vpop.f32.mrb[2].mxu1 }
 0x32c   :  { %v602_v44 = vadd.f32 %v1166_v10, %v601_v42  ;;  %v1251_v45 = vpop.f32.mrb[3].mxu1  ;;  %v804_v10 = vld [vmem:[%s2171_s7 + $0x358] sm:$0xff]  ;;  %s1431_s7 = smov 112  }
 0x32d   :  { %v1401_v35 = vpack.c.bf16 %v808_v29, %v804_v10 }
 0x32e   :  { %v605_v53 = vmax.f32 %v602_v44, 0.0 }
 0x32f   :  { %1402 = vmatprep.subr.bf16.mxu0 %v1401_v35 }
 0x330   :  { %v611_v60 = vsel %vm610_vm8, %v605_v53, 0.0  ;;  %v609_v61 = vsel %vm608_vm15, %v605_v53, 0.0  ;;  %v613_v62 = vsel %vm612_vm9, %v605_v53, 0.0  ;;  %v625_v63 = vsel %vm624_vm10, %v605_v53, 0.0  ;;  %1404 = vmatpush1.bf16.msra.mxu0 %v1403_v34 }
 0x331   :  { %639 = vrot.lane.b32.xlu1 %v611_v60, %s1423_s19  ;;  %635 = vrot.lane.b32.xlu0 %v609_v61, %s1427_s0  ;;  %v615_v6 = vsel %vm614_vm11, %v605_v53, 0.0  ;;  %v627_v7 = vsel %vm626_vm13, %v605_v53, 0.0  ;;  %v617_v8 = vsel %vm616_vm14, %v605_v53, 0.0  ;;  %v629_v11 = vsel %vm628_vm0, %v605_v53, 0.0 }
 0x332   :  { %v619_v13 = vsel %vm618_vm12, %v605_v53, 0.0  ;;  %v631_v14 = vsel %vm630_vm1, %v605_v53, 0.0  ;;  %v621_v15 = vsel %vm620_vm6, %v605_v53, 0.0  ;;  %v633_v16 = vsel %vm632_vm5, %v605_v53, 0.0 }
 0x333   :  { %v607_v18 = vsel %vm606_vm4, %v605_v53, 0.0  ;;  %v2083_v55 = vsel %vm622_vm3, %v605_v53, 0.0  ;;  %vm684_vm3 = vcmask 392192   ;;  %vm687_vm4 = vcmask 654336  }
 0x334   :  { %vm2184_vm5 = vcmask 523264   ;;  %vm690_vm6 = vcmask 916480   ;;  %vm2185_vm8 = vcmask 785408   ;;  %vm2190_vm11 = vcmask 64512  }
 0x335   :  { %643 = vrot.lane.b32.xlu1 %v613_v62, %s1428_s14  ;;  %663 = vrot.lane.b32.xlu0 %v625_v63, %s1427_s0  ;;  %vm2186_vm15 = vmmov %vm2184_vm5  ;;  %v1062_v63 = vmul.f32 %v986_v49, %v986_v49  ;;  %vm979_vm13 = vcmask 123904   ;;  %vm1145_vm14 = vcmask 1024  }
 0x336   :  { %vm2187_vm9 = vmmov %vm2185_vm8 }
 0x337   :  { %vm2188_vm10 = vmmov %vm2185_vm8 }
 0x339   :  { %647 = vrot.lane.b32.xlu1 %v615_v6, %s1422_s18  ;;  %667 = vrot.lane.b32.xlu0 %v627_v7, %s1423_s19  ;;  %v1170_v7 = vld [vmem:[%s2174_s8] ss:$0 sm:$0xff] }
 0x33d   :  { %651 = vrot.lane.b32.xlu1 %v617_v8, %s1429_s24  ;;  %671 = vrot.lane.b32.xlu0 %v629_v11, %s1428_s14  ;;  %v1409_v11 = vpack.c.bf16 %v1063_v4, %v1062_v63 }
 0x341   :  { %655 = vrot.lane.b32.xlu1 %v619_v13, %s1430_s25  ;;  %675 = vrot.lane.b32.xlu0 %v631_v14, %s1422_s18 }
 0x345   :  { %659 = vrot.lane.b32.xlu1 %v621_v15, %s1431_s7  ;;  %679 = vrot.lane.b32.xlu0 %v633_v16, %s1429_s24  ;;  %v810_v15 = vstv %s2175_s10 }
 0x349   :  { %967 = vrot.lane.b32.xlu0 %v966_v36, %s1432_s2 }
 0x3a3   :  { %v640_v37 = vpop.permute.xlu1 %639  ;;  %v636_v38 = vpop.permute.xlu0 %635 }
 0x3a4   :  { %v682_v45 = vsel %vm325_vm7, %v607_v18, %v636_v38 }
 0x3a5   :  { %v683_v46 = vsel %vm147_vm2, %v682_v45, %v640_v37 }
 0x3a7   :  { %v644_v39 = vpop.permute.xlu1 %643  ;;  %v664_v40 = vpop.permute.xlu0 %663 }
 0x3a8   :  { %v685_v51 = vsel %vm684_vm3, %v683_v46, %v644_v39  ;;  %v692_v52 = vsel %vm325_vm7, %v2083_v55, %v664_v40 }
 0x3ab   :  { %v648_v41 = vpop.permute.xlu1 %647  ;;  %v668_v42 = vpop.permute.xlu0 %667 }
 0x3ac   :  { %v686_v53 = vsel %vm2184_vm5, %v685_v51, %v648_v41  ;;  %v693_v54 = vsel %vm147_vm2, %v692_v52, %v668_v42  ;;  %vm2189_vm2 = vmmov 0  }
 0x3af   :  { %v652_v43 = vpop.permute.xlu1 %651  ;;  %v672_v44 = vpop.permute.xlu0 %671 }
 0x3b0   :  { %v688_v56 = vsel %vm687_vm4, %v686_v53, %v652_v43  ;;  %v694_v57 = vsel %vm684_vm3, %v693_v54, %v672_v44 }
 0x3b3   :  { %v656_v47 = vpop.permute.xlu1 %655  ;;  %v676_v48 = vpop.permute.xlu0 %675 }
 0x3b4   :  { %v689_v59 = vsel %vm2185_vm8, %v688_v56, %v656_v47  ;;  %v695_v60 = vsel %vm2186_vm15, %v694_v57, %v676_v48 }
 0x3b7   :  { %v660_v61 = vpop.permute.xlu1 %659  ;;  %v680_v62 = vpop.permute.xlu0 %679 }
 0x3b8   :  { %v691_v5 = vsel %vm690_vm6, %v689_v59, %v660_v61  ;;  %v696_v6 = vsel %vm687_vm4, %v695_v60, %v680_v62 }
 0x3b9   :  { %1168 = vmatprep.mubr.msk.f32.mxu1 %vm2187_vm9, %v696_v6  ;;  %1169 = vmatprep.mubr.msk.f32.mxu0 %vm2188_vm10, %v696_v6 }
 0x3ba   :  { %879 = vmatmul.mubr.f32.vlgmr.msra.gmra.mrb[4].mxu1 %v691_v5  ;;  %950 = vmatmul.mubr.f32.vlgmr.msra.gmra.mrb[8].mxu0 %v691_v5 }
 0x3bb   :  { %1407 = vmatpush3.bf16.msra.mxu1 %v1406_v58  ;;  %v968_v8 = vpop.permute.xlu0 %967  ;;  %1256 = vmatprep.mubr.msk.f32.mxu1 %vm2189_vm2, %v1426_v33 }
 0x3bc   :  { %v970_v12 = vsel %vm2190_vm11, %v1727_v28, %v968_v8  ;;  %1408 = vmatprep.subr.bf16.mxu1 %v1424_v27 }
 0x3bd   :  { %v978_v0 = vmul.f32 %v1170_v7, %v970_v12  ;;  %v1061_v14 = vmul.f32 %v970_v12, %v970_v12 }
 0x3be   :  { %1257 = vmatmul.mubr.msk.f32.vlgmr.msra.gmra.mrb[6].mxu1 %vm325_vm7, %v970_v12 }
 0x3bf   :  { %1410 = vmatpush3.bf16.msra.mxu1 %v1409_v11  ;;  %v980_v13 = vsel %vm979_vm13, %v978_v0, 0.0  ;;  %1263 = vmatprep.mubr.msk.f32.mxu1 %vm2189_vm2, %v1426_v33 }
 0x3c0   :  { %981 = vadd.xlane.f32.xlu1 %v980_v13 }
 0x3c2   :  { %1264 = vmatmul.mubr.msk.f32.vlgmr.msra.gmra.mrb[8].mxu1 %vm325_vm7, %v1061_v14  ;;  %vm1139_vm7 = vcmask 25600  }
 0x44d   :  { %v982_v26 = vpop.xlane.xlu1 %981 }
 0x44e   :  { %v985_v29 = vadd.f32 %v984_v25, %v982_v26 }
 0x48d   :  { %v880_v28 = vpop.f32.mrb[4].mxu1  ;;  %v951_v16 = vpop.f32.mrb[8].mxu0 }
 0x48e   :  { %v881_v27 = vadd.f32 %v880_v28, %v810_v15  ;;  %v952_v1 = vadd.f32 %v951_v16, %v810_v15  ;;  %v882_v17 = vpop.f32.mrb[5].mxu1  ;;  %v953_v18 = vpop.f32.mrb[9].mxu0 }
 0x48f   :  { %v883_v55 = vadd.f32 %v882_v17, %v810_v15  ;;  %v954_v3 = vadd.f32 %v953_v18, %v810_v15 }
 0x491   :  { %v960_v9 = vcombine.low %v881_v27, %v883_v55  ;;  %v961_v19 = vcombine.low %v952_v1, %v954_v3  ;;  %v1057_v2 = vpop.f32.mrb[6].mxu1 }
 0x492   :  { %v1258_v33 = vpop.f32.mrb[7].mxu1  ;;  %v1137_v20 = vmul.f32 %v1057_v2, %v1057_v2 }
 0x493   :  { %964 = vst [vmem:[%s2176_s13] sm:$0xff] %v960_v9  ;;  %965 = vst [vmem:[%s2176_s13 + $0x8] sm:$0xff] %v961_v19 }
 0x495   :  { %v1133_v21 = vpop.f32.mrb[8].mxu1 }
 0x496   :  { %v1138_v23 = vsub.f32 %v1137_v20, %v1133_v21  ;;  %v1265_v22 = vpop.f32.mrb[9].mxu1 }
 0x498   :  { %v1140_v24 = vsel %vm1139_vm7, %v1138_v23, 0.0 }
 0x499   :  { %1141 = vadd.xlane.f32.xlu0 %v1140_v24 }
 0x526   :  { %v1142_v10 = vpop.xlane.xlu0 %1141 }
 0x527   :  { %v1143_v30 = vmul.f32 0.5, %v1142_v10 }
 0x529   :  { %v1144_v31 = vadd.f32 %v1143_v30, %v985_v29 }
 0x52b   :  { %1146 = vst.msk [vmem:[%s2178_s12] sm:$0x3] %vm1145_vm14, %v1144_v31 }

</bundles_post_ra>
